<compile_context>
chip_gen: v6e
topology: v6e:2x2x1
jax: 0.10.0
libtpu: 0.0.40
codegen_flags: <defaults>
</compile_context>

<pallas_src>
import functools

import jax
import jax.numpy as jnp
from jax import lax
from jax.experimental import pallas as pl
from jax.experimental.pallas import tpu as pltpu

_EPS = 1e-5


# ============================  generation-aware budgets  ============================

def _device_kind():
    try:
        return jax.devices()[0].device_kind.lower()
    except Exception:
        return ""


_KIND = _device_kind()
_IS_MULTI_TC = "v7" in _KIND          # 2 TensorCores per chip on v7x


def _vmem_capacity_bytes():
    try:
        return int(pltpu.get_tpu_info().vmem_capacity_bytes)
    except Exception:
        pass
    if "v7" in _KIND:
        return 64 * 1024 * 1024
    return 128 * 1024 * 1024          # v5e / v6e


_VMEM_PHYS = _vmem_capacity_bytes()
_VMEM_LIMIT = int(0.80 * _VMEM_PHYS)          # scoped request; leave Mosaic headroom
_SA_ACT_BUDGET = _VMEM_LIMIT // 6             # per-block activation budget in sa_fused
_KTILE_CAP = 4096 if _VMEM_LIMIT > (80 << 20) else 2048
# bf16 EUP exists on v6e/v7x only; keep the density exp in f32 elsewhere.
_EXP_DTYPE = jnp.bfloat16 if ("v6" in _KIND or "v7" in _KIND) else jnp.float32


# ============================  small helpers  ============================

def _round_up(x, m):
    return (x + m - 1) // m * m


def _pick_block(n, cap):
    """Largest multiple-of-8 divisor of n that is <= cap (n is a mult. of 8)."""
    if n <= cap:
        return n
    t = (cap // 8) * 8
    while t > 8 and n % t:
        t -= 8
    return t if n % t == 0 else 8


def _pick_ktile(k, cap):
    """Largest multiple-of-128 divisor of k that is <= cap (k is a mult of 128)."""
    if k <= cap:
        return k
    t = cap
    while t > 128 and k % t:
        t -= 128
    return t


def _m_tiling(m, cap=256):
    """Row padding / row-tile size (multiples of 16 so bf16 blocks are legal)."""
    mp = _round_up(m, 16)
    if mp <= cap:
        return mp, mp
    mp = _round_up(m, cap)
    return mp, cap


# ============================  density / distance kernels  ============================

def _density_kernel(xk_ref, xq_ref, o_ref, qq_ref, *, inv_2b2, scale, exp_dtype):
    """Gaussian KDE: accumulates sum_j exp(-||q_i-k_j||^2/(2bw^2)) per query tile."""
    kidx = pl.program_id(2)

    @pl.when(kidx == 0)
    def _():
        o_ref[...] = jnp.zeros_like(o_ref)
        xq = xq_ref[...]
        # per-query sum of squares is invariant over the key grid axis -> scratch
        qq_ref[...] = lax.dot_general(jnp.ones((1, 3), jnp.float32), xq * xq,
                                      (((1,), (1,)), ((), ())),
                                      preferred_element_type=jnp.float32)   # [1, tq]

    xk = xk_ref[...]                                        # [tk, 3]
    kk = jnp.sum(xk * xk, axis=-1, keepdims=True)           # [tk, 1]
    kq = lax.dot_general(xk, xq_ref[...], (((1,), (1,)), ((), ())),
                         preferred_element_type=jnp.float32)               # [tk, tq]
    d = kk + qq_ref[...] - 2.0 * kq
    g = jnp.exp((d * (-inv_2b2)).astype(exp_dtype))          # EUP (bf16 on v6e/v7x)
    part = lax.dot_general(jnp.ones((1, xk.shape[0]), g.dtype), g,
                           (((1,), (0,)), ((), ())),
                           preferred_element_type=jnp.float32)             # [1, tq]
    o_ref[...] += part

    @pl.when(kidx == pl.num_programs(2) - 1)
    def _():
        # 1/(2.5*bw) and 1/N folded into a single final scale
        o_ref[...] = o_ref[...] * scale


@functools.partial(jax.jit, static_argnames=("bandwidth",))
def compute_density(xyz, bandwidth):
    """xyz: [B, N, 3] -> gaussian KDE density [B, N]."""
    B, N, _ = xyz.shape
    if N <= 1024:
        Np = _round_up(N, 8)
        tq = Np
    else:
        Np = _round_up(N, 1024)
        tq = 1024
    tk = _pick_block(Np, 512)
    xyz_p = xyz.astype(jnp.float32)
    if Np != N:
        # padded points are pushed far away -> exp underflows to exactly 0
        pad = jnp.full((B, Np - N, 3), 1e6, jnp.float32)
        xyz_p = jnp.concatenate([xyz_p, pad], axis=1)
    inv_2b2 = 1.0 / (2.0 * float(bandwidth) ** 2)
    scale = 1.0 / (2.5 * float(bandwidth) * N)
    out = pl.pallas_call(
        functools.partial(_density_kernel, inv_2b2=inv_2b2, scale=scale,
                          exp_dtype=_EXP_DTYPE),
        out_shape=jax.ShapeDtypeStruct((B, 1, Np), jnp.float32),
        grid_spec=pltpu.PrefetchScalarGridSpec(
            num_scalar_prefetch=0,
            grid=(B, Np // tq, Np // tk),
            in_specs=[pl.BlockSpec((None, tk, 3), lambda b, q, k: (b, k, 0)),
                      pl.BlockSpec((None, tq, 3), lambda b, q, k: (b, q, 0))],
            out_specs=pl.BlockSpec((None, 1, tq), lambda b, q, k: (b, 0, q)),
            scratch_shapes=[pltpu.VMEM((1, tq), jnp.float32)]),
        compiler_params=pltpu.CompilerParams(
            dimension_semantics=("parallel", "parallel", "arbitrary"),
            vmem_limit_bytes=_VMEM_LIMIT),
    )(xyz_p, xyz_p)
    return out[:, 0, :N]


def _sqdist_kernel(a_ref, b_ref, o_ref):
    a = a_ref[...]                                        # [ts, 3]
    b = b_ref[...]                                        # [Np, 3]
    aa = jnp.sum(a * a, axis=-1, keepdims=True)           # [ts, 1]
    bb = lax.dot_general(jnp.ones((1, 3), jnp.float32), b * b,
                         (((1,), (1,)), ((), ())),
                         preferred_element_type=jnp.float32)          # [1, Np]
    ab = lax.dot_general(a, b, (((1,), (1,)), ((), ())),
                         preferred_element_type=jnp.float32)          # [ts, Np]
    o_ref[...] = aa + bb - 2.0 * ab


@jax.jit
def pairwise_sqdist(a, b):
    """a: [B, S, 3] queries, b: [B, N, 3] keys -> [B, Sp, Np] squared distances.

    Padded key columns are placed far away so they never win a top-k."""
    B, S, _ = a.shape
    _, N, _ = b.shape
    Sp = _round_up(S, 8)
    Np = _round_up(N, 128)
    ts = _pick_block(Sp, 256)
    a_p = jnp.pad(a.astype(jnp.float32), ((0, 0), (0, Sp - S), (0, 0)))
    b_p = b.astype(jnp.float32)
    if Np != N:
        pad = jnp.full((B, Np - N, 3), 1e6, jnp.float32)
        b_p = jnp.concatenate([b_p, pad], axis=1)
    return pl.pallas_call(
        _sqdist_kernel,
        out_shape=jax.ShapeDtypeStruct((B, Sp, Np), jnp.float32),
        grid_spec=pltpu.PrefetchScalarGridSpec(
            num_scalar_prefetch=0,
            grid=(B, Sp // ts),
            in_specs=[pl.BlockSpec((None, ts, 3), lambda bb_, s: (bb_, s, 0)),
                      pl.BlockSpec((None, Np, 3), lambda bb_, s: (bb_, 0, 0))],
            out_specs=pl.BlockSpec((None, ts, Np), lambda bb_, s: (bb_, s, 0))),
        compiler_params=pltpu.CompilerParams(
            dimension_semantics=("parallel", "parallel"),
            vmem_limit_bytes=_VMEM_LIMIT),
    )(a_p, b_p)


def knn_point(nsample, xyz, new_xyz):
    # xyz: [B, N, 3] keys, new_xyz: [B, S, 3] queries -> [B, S, nsample] indices
    S = new_xyz.shape[1]
    d = pairwise_sqdist(new_xyz, xyz)
    _, idx = lax.top_k(-d, nsample)          # nearest first
    return idx[:, :S, :]


# ============================  farthest point sampling (Pallas)  ============================

def _fps_kernel(xyz_ref, o_ref, dist_ref, *, npoint, n_valid):
    """xyz_ref: [3, Np] (lane-dense), o_ref: [1, Sp] int32, dist_ref: [1, Np] scratch.

    xyz and the running min-distance row stay VMEM-resident for all npoint
    iterations; index selection uses masked lane reductions (no dynamic ref
    indexing needed)."""
    np_ = xyz_ref.shape[1]
    lane = lax.broadcasted_iota(jnp.int32, (1, np_), 1)
    out_lane = lax.broadcasted_iota(jnp.int32, o_ref.shape, 1)
    # padded lanes start at -1 so they can never be argmax; valid lanes at 1e10
    dist_ref[...] = jnp.where(lane < n_valid, jnp.float32(1e10), jnp.float32(-1.0))
    o_ref[...] = jnp.zeros_like(o_ref)
    xyz = xyz_ref[...]                                          # [3, Np]

    def body(i, farthest):
        o_ref[...] = jnp.where(out_lane == i, farthest, o_ref[...])
        sel = (lane == farthest)                                # [1, Np]
        centroid = jnp.sum(jnp.where(sel, xyz, 0.0), axis=1, keepdims=True)   # [3, 1]
        d = jnp.sum((xyz - centroid) ** 2, axis=0, keepdims=True)             # [1, Np]
        nd = jnp.minimum(dist_ref[...], d)
        dist_ref[...] = nd
        maxval = jnp.max(nd)
        far = jnp.min(jnp.where(nd >= maxval, lane, np_))       # first index of the max
        return far.astype(jnp.int32)

    lax.fori_loop(0, npoint, body, jnp.zeros((), jnp.int32))


@functools.partial(jax.jit, static_argnames=("npoint",))
def farthest_point_sample(xyz, npoint):
    # TODO(synk): PyTorch seeds FPS with torch.randint; fixed start at index 0 here.
    B, N, _ = xyz.shape
    Np = _round_up(N, 128)
    Sp = _round_up(npoint, 128)
    xcf = jnp.transpose(xyz, (0, 2, 1)).astype(jnp.float32)     # [B, 3, N]
    if Np != N:
        xcf = jnp.pad(xcf, ((0, 0), (0, 0), (0, Np - N)))
    idx = pl.pallas_call(
        functools.partial(_fps_kernel, npoint=npoint, n_valid=N),
        out_shape=jax.ShapeDtypeStruct((B, 1, Sp), jnp.int32),
        grid_spec=pltpu.PrefetchScalarGridSpec(
            num_scalar_prefetch=0,
            grid=(B,),
            in_specs=[pl.BlockSpec((None, 3, Np), lambda b: (b, 0, 0))],
            out_specs=pl.BlockSpec((None, 1, Sp), lambda b: (b, 0, 0)),
            scratch_shapes=[pltpu.VMEM((1, Np), jnp.float32)]),
        compiler_params=pltpu.CompilerParams(
            dimension_semantics=("parallel",),
            vmem_limit_bytes=_VMEM_LIMIT),
    )(xcf)
    return idx[:, 0, :npoint]


# ============================  fused dense kernels  ============================

def _mlp_kernel(*refs, n_layers, acts):
    """Sequential dense layers; the activation tile never leaves VMEM."""
    x_ref, o_ref = refs[0], refs[-1]
    h = x_ref[...]
    a = None
    for i in range(n_layers):
        w = refs[1 + 2 * i][...]
        sb = refs[2 + 2 * i][...]
        a = jnp.dot(h, w, preferred_element_type=jnp.float32)
        a = a * sb[0:1, :] + sb[1:2, :]
        if acts[i]:
            a = jnp.maximum(a, 0.0)
        h = a.astype(jnp.bfloat16) if (i + 1) < n_layers else a
    o_ref[...] = a.astype(o_ref.dtype)


def fused_mlp(x, layers, acts):
    """x:[M,K0] -> fused dense stack (weights VMEM-resident, M tiled)."""
    M, K0 = x.shape
    n_last = layers[-1][0].shape[1]
    Mp, tm = _m_tiling(M)
    if Mp == M and x.dtype == jnp.bfloat16:
        xp = x
    else:
        xp = jnp.pad(x.astype(jnp.bfloat16), ((0, Mp - M), (0, 0)))
    flat, in_specs = [], [pl.BlockSpec((tm, K0), lambda m: (m, 0))]
    for (w, sb) in layers:
        flat += [w, sb]
        in_specs.append(pl.BlockSpec(w.shape, lambda m: (0, 0)))
        in_specs.append(pl.BlockSpec(sb.shape, lambda m: (0, 0)))
    out = pl.pallas_call(
        functools.partial(_mlp_kernel, n_layers=len(layers), acts=tuple(acts)),
        out_shape=jax.ShapeDtypeStruct((Mp, n_last), jnp.float32),
        grid_spec=pltpu.PrefetchScalarGridSpec(
            num_scalar_prefetch=0,
            grid=(Mp // tm,),
            in_specs=in_specs,
            out_specs=pl.BlockSpec((tm, n_last), lambda m: (m, 0))),
        compiler_params=pltpu.CompilerParams(
            dimension_semantics=("parallel",),
            vmem_limit_bytes=_VMEM_LIMIT),
    )(xp, *flat)
    return out[:M]


def _linear_kernel(x_ref, w_ref, sb_ref, o_ref, acc_ref, *, act):
    """Single dense layer, K tiled; f32 accumulation in VMEM scratch, bf16 out."""
    k = pl.program_id(1)

    @pl.when(k == 0)
    def _():
        acc_ref[...] = jnp.zeros_like(acc_ref)

    acc_ref[...] += jnp.dot(x_ref[...], w_ref[...],
                            preferred_element_type=jnp.float32)

    @pl.when(k == pl.num_programs(1) - 1)
    def _():
        sb = sb_ref[...]
        y = acc_ref[...] * sb[0:1, :] + sb[1:2, :]
        if act:
            y = jnp.maximum(y, 0.0)
        o_ref[...] = y.astype(o_ref.dtype)


def fused_linear(x, layer, act=True, out_dtype=jnp.bfloat16):
    """y = act((x @ W) * scale + bias); grid = (M "parallel", K "arbitrary")."""
    W, sb = layer
    M, K = x.shape
    N = W.shape[1]
    Mp, tm = _m_tiling(M)
    tk = _pick_ktile(K, _KTILE_CAP)
    if Mp == M and x.dtype == jnp.bfloat16:
        xp = x
    else:
        xp = jnp.pad(x.astype(jnp.bfloat16), ((0, Mp - M), (0, 0)))
    out = pl.pallas_call(
        functools.partial(_linear_kernel, act=act),
        out_shape=jax.ShapeDtypeStruct((Mp, N), out_dtype),
        grid_spec=pltpu.PrefetchScalarGridSpec(
            num_scalar_prefetch=0,
            grid=(Mp // tm, K // tk),
            in_specs=[pl.BlockSpec((tm, tk), lambda m, k: (m, k)),
                      pl.BlockSpec((tk, N), lambda m, k: (k, 0)),
                      pl.BlockSpec((2, N), lambda m, k: (0, 0))],
            out_specs=pl.BlockSpec((tm, N), lambda m, k: (m, 0)),
            scratch_shapes=[pltpu.VMEM((tm, N), jnp.float32)]),
        compiler_params=pltpu.CompilerParams(
            dimension_semantics=("parallel", "arbitrary"),
            vmem_limit_bytes=_VMEM_LIMIT),
    )(xp, W, sb)
    return out[:M]


# ============================  fused set-abstraction kernel  ============================

def _small_net(x, packs):
    """DensityNet / WeightNet stacks.  >=2-wide layers run as tiny MXU dots
    (the MXU has slack in this kernel); the 1-wide first DensityNet layer is a
    single VPU broadcast-mul.  All layers ReLU (matches the reference code).

    Each pack is an f32 ref [K+2, N]: K weight rows, fused BN scale row, bias row."""
    h = x
    for pk_ref in packs:
        pk = pk_ref[...]
        kin = pk.shape[0] - 2
        if kin == 1:
            a = h[:, 0:1] * pk[0:1, :]
        else:
            a = jnp.dot(h, pk[:kin, :], preferred_element_type=jnp.float32)
        h = jnp.maximum(a * pk[kin:kin + 1, :] + pk[kin + 1:kin + 2, :], 0.0)
    return h


def _sa_fused_kernel(feat_ref, dens_ref,
                     wm0, sb0, wm1, sb1, wm2, sb2,
                     dn0, dn1, dn2,
                     wn0, wn1, wn2,
                     o_ref, *, gt, kk):
    c_out = o_ref.shape[2]

    # ---- shared 1x1-conv MLP stack (MXU, bf16 in / f32 accumulate) ----
    x = feat_ref[...]                                    # [gt*kk, C_in] bf16
    h, a = x, None
    for (w_r, sb_r) in ((wm0, sb0), (wm1, sb1), (wm2, sb2)):
        a = jnp.dot(h, w_r[...], preferred_element_type=jnp.float32)
        sb = sb_r[...]
        a = jnp.maximum(a * sb[0:1, :] + sb[1:2, :], 0.0)
        h = a.astype(jnp.bfloat16)
    feat = a                                             # [gt*kk, c_out] f32

    # ---- DensityNet on the max-normalised inverse density ----
    dscale = _small_net(dens_ref[...], (dn0, dn1, dn2))        # [gt*kk, 1]
    feat = feat * dscale

    # ---- WeightNet on grouped relative coordinates ----
    xyz = x[:, 0:3].astype(jnp.float32)                        # [gt*kk, 3]
    wgt = _small_net(xyz, (wn0, wn1, wn2))                     # [gt*kk, 16]

    # ---- per-group W^T @ feat: contract the shared K axis directly (no
    #      explicit transposed copy; Mosaic feeds the MXU the T-LHS form) ----
    wg3 = wgt.reshape(gt, kk, 16).astype(jnp.bfloat16)
    f3 = feat.reshape(gt, kk, c_out).astype(jnp.bfloat16)
    psum = lax.dot_general(wg3, f3, (((1,), (1,)), ((0,), (0,))),
                           preferred_element_type=jnp.float32)   # [gt, 16, c_out]
    o_ref[...] = psum.astype(o_ref.dtype)


def _pick_gt(G, K, C_in, params, c_out):
    """Groups per block, sized to the generation-aware VMEM activation budget."""
    widths = [w.shape[1] for (w, _) in params["mlp"]]
    per_group = (2 * K * C_in * 2                 # double-buffered bf16 input block
                 + 2 * K * 64                     # lane-padded density column (x2 buffers)
                 + K * (C_in + sum(widths)) * 6   # f32 + bf16 activation copies
                 + K * (16 + 16 + 64) * 4         # DensityNet / WeightNet activations
                 + 16 * c_out * 12)               # f32 psum + double-buffered bf16 out
    gt = int(_SA_ACT_BUDGET // max(per_group, 1))
    gt = max(16, (gt // 16) * 16)
    if gt >= G:
        gt = _round_up(G, 16)
        if _IS_MULTI_TC and G >= 32:
            # expose >=2 grid steps so both TensorCores get work on v7x
            gt = max(16, _round_up((G + 1) // 2, 16))
    return gt


def sa_fused(new_points, dens_norm, params, c_out):
    """new_points: [G, K, C_in], dens_norm: [G, K] (max-normalised inv. density).

    Returns [Gp, 16*c_out] (bf16): flattened per-group WeightNet^T @ features,
    ready for the final Linear+BN+ReLU (fused_linear)."""
    G, K, C_in = new_points.shape
    gt = _pick_gt(G, K, C_in, params, c_out)
    Gp = _round_up(G, gt)

    feat2 = jnp.pad(new_points.reshape(G * K, C_in).astype(jnp.bfloat16),
                    ((0, (Gp - G) * K), (0, 0)))
    dens2 = jnp.pad(dens_norm.reshape(G * K, 1).astype(jnp.float32),
                    ((0, (Gp - G) * K), (0, 0)))

    wm, dn, wn = params["mlp"], params["densitynet"], params["weightnet"]
    flat = [wm[0][0], wm[0][1], wm[1][0], wm[1][1], wm[2][0], wm[2][1],
            dn[0], dn[1], dn[2], wn[0], wn[1], wn[2]]
    w_specs = [pl.BlockSpec(a.shape, lambda g: (0, 0)) for a in flat]

    out = pl.pallas_call(
        functools.partial(_sa_fused_kernel, gt=gt, kk=K),
        out_shape=jax.ShapeDtypeStruct((Gp, 16, c_out), jnp.bfloat16),
        grid_spec=pltpu.PrefetchScalarGridSpec(
            num_scalar_prefetch=0,
            grid=(Gp // gt,),
            in_specs=[pl.BlockSpec((gt * K, C_in), lambda g: (g, 0)),
                      pl.BlockSpec((gt * K, 1), lambda g: (g, 0))] + w_specs,
            out_specs=pl.BlockSpec((gt, 16, c_out), lambda g: (g, 0, 0))),
        compiler_params=pltpu.CompilerParams(
            dimension_semantics=("parallel",),
            vmem_limit_bytes=_VMEM_LIMIT),
    )(feat2, dens2, *flat)
    return out.reshape(Gp, 16 * c_out)


# ============================  per-tooth heads (batched)  ============================

def _heads_kernel(x_ref, w_ref, b_ref, o_ref):
    acc = lax.dot_general(x_ref[...], w_ref[...],
                          (((2,), (1,)), ((0,), (0,))),
                          preferred_element_type=jnp.float32)   # [T, B, V]
    o_ref[...] = acc + b_ref[...]


def fused_heads(x, w, b):
    """x: [B, T, C], w: [T, C, V], b: [T, 1, V] -> [B, T, V]; one pallas_call."""
    B, T, C = x.shape
    V = w.shape[-1]
    xt = jnp.transpose(x, (1, 0, 2)).astype(jnp.bfloat16)       # [T, B, C]
    out = pl.pallas_call(
        _heads_kernel,
        out_shape=jax.ShapeDtypeStruct((T, B, V), jnp.float32),
        grid_spec=pltpu.PrefetchScalarGridSpec(
            num_scalar_prefetch=0,
            grid=(1,),
            in_specs=[pl.BlockSpec((T, B, C), lambda i: (0, 0, 0)),
                      pl.BlockSpec((T, C, V), lambda i: (0, 0, 0)),
                      pl.BlockSpec((T, 1, V), lambda i: (0, 0, 0))],
            out_specs=pl.BlockSpec((T, B, V), lambda i: (0, 0, 0))),
        compiler_params=pltpu.CompilerParams(vmem_limit_bytes=_VMEM_LIMIT),
    )(xt, w, b)
    return jnp.transpose(out, (1, 0, 2))


# ============================  JAX glue (indexing)  ============================

def index_points(points, idx):
    # points: [B, N, C], idx: [B, ...] -> [B, ..., C]
    return jax.vmap(lambda p, i: p[i])(points, idx)


# ============================  parameters  ============================

def _init_linear(key, cin, cout):
    k1, k2 = jax.random.split(key)
    lim = 1.0 / jnp.sqrt(float(cin))
    W = jax.random.uniform(k1, (cin, cout), jnp.float32, -lim, lim)
    b = jax.random.uniform(k2, (cout,), jnp.float32, -lim, lim)
    return W, b


def _init_bn(key, c):
    k1, k2, k3, k4 = jax.random.split(key, 4)
    gamma = jax.random.uniform(k1, (c,), jnp.float32, 0.8, 1.2)
    beta = 0.1 * jax.random.normal(k2, (c,), jnp.float32)
    mean = 0.1 * jax.random.normal(k3, (c,), jnp.float32)
    var = jax.random.uniform(k4, (c,), jnp.float32, 0.5, 1.5)
    return gamma, beta, mean, var


def _mxu_layer(key, cin, cout, with_bn=True):
    """(W bf16 [cin, cout], sb f32 [2, cout]) with eval-mode BN pre-fused."""
    k1, k2 = jax.random.split(key)
    W, b = _init_linear(k1, cin, cout)
    if with_bn:
        gamma, beta, mean, var = _init_bn(k2, cout)
        scale = gamma / jnp.sqrt(var + _EPS)
        bias = (b - mean) * scale + beta
    else:
        scale = jnp.ones((cout,), jnp.float32)
        bias = b
    return W.astype(jnp.bfloat16), jnp.stack([scale, bias], axis=0)


def _vpu_layer(key, cin, cout):
    """Packed f32 [cin+2, cout]: weight rows + fused BN scale row + bias row."""
    k1, k2 = jax.random.split(key)
    W, b = _init_linear(k1, cin, cout)
    gamma, beta, mean, var = _init_bn(k2, cout)
    scale = gamma / jnp.sqrt(var + _EPS)
    bias = (b - mean) * scale + beta
    return jnp.concatenate([W, scale[None], bias[None]], axis=0)


def make_sa_params(key, in_channel, mlp):
    keys = iter(jax.random.split(key, 32))
    p = {}
    convs, last = [], in_channel
    for out in mlp:                                   # 1x1 Conv2d + BN2d (+ReLU)
        convs.append(_mxu_layer(next(keys), last, out))
        last = out
    p["mlp"] = convs
    dn, last = [], 1                                  # DensityNet: 1 -> 16 -> 8 -> 1
    for out in (16, 8, 1):
        dn.append(_vpu_layer(next(keys), last, out))
        last = out
    p["densitynet"] = dn
    wn, last = [], 3                                  # WeightNet: 3 -> 8 -> 8 -> 16
    for out in (8, 8, 16):
        wn.append(_vpu_layer(next(keys), last, out))
        last = out
    p["weightnet"] = wn
    # NOTE: the (16, C) product is flattened weight-major here (equivalent
    # re-parametrisation of the reference Linear; weights are random-init).
    p["linear"] = _mxu_layer(next(keys), 16 * mlp[-1], mlp[-1])
    return p


def make_encoder_params(key, feature_dim=3, scale=1,
                        base_npoint=(16, 8), base_nsample=(8, 8)):
    # NOTE: original module uses npoint=(512,128)*scale, nsample=(32,64)*scale;
    # reduced so the demo point clouds can stay small.
    keys = jax.random.split(key, 8)
    p = {}
    p["sa1"] = make_sa_params(keys[0], feature_dim + 3, [64, 64, 128])
    p["sa1_cfg"] = dict(npoint=base_npoint[0] * scale, nsample=base_nsample[0] * scale,
                        bandwidth=0.1, group_all=False)
    p["sa2"] = make_sa_params(keys[1], 128 + 3, [128, 128, 256])
    p["sa2_cfg"] = dict(npoint=base_npoint[1] * scale, nsample=base_nsample[1] * scale,
                        bandwidth=0.2, group_all=False)
    p["sa3"] = make_sa_params(keys[2], 256 + 3, [256, 512, 1024])
    p["sa3_cfg"] = dict(npoint=1, nsample=None, bandwidth=0.4, group_all=True)
    p["fc"] = [_mxu_layer(keys[3], 1024, 512), _mxu_layer(keys[4], 512, 256)]
    return p


def make_model_params(key, nvalues, ntooth):
    keys = jax.random.split(key, 6)
    p = {"ntooth": ntooth, "nvalues": nvalues}
    p["tooth_encoder"] = make_encoder_params(keys[0], scale=1)
    p["jaw_encoder"] = make_encoder_params(keys[1], scale=2)
    fpm_dim = 256                                     # FPM out_features must match 256
    p["fpm"] = [_mxu_layer(keys[2], 2 * fpm_dim, fpm_dim, with_bn=False),
                _mxu_layer(keys[3], fpm_dim, fpm_dim, with_bn=False)]
    hk = jax.random.split(keys[4], ntooth)
    Ws, bs = [], []
    for i in range(ntooth):
        W, b = _init_linear(hk[i], fpm_dim, nvalues)
        Ws.append(W)
        bs.append(b)
    p["head_w"] = jnp.stack(Ws, axis=0).astype(jnp.bfloat16)     # [T, 256, V]
    p["head_b"] = jnp.stack(bs, axis=0)[:, None, :]              # [T, 1, V]
    return p


# ============================  forward passes  ============================

def sa_forward(params, xyz, points, *, npoint, nsample, bandwidth, group_all):
    """PointConvDensitySetAbstraction (channels-last): ([B,N,3],[B,N,D]) -> ([B,S,3],[B,S,C])."""
    B, N, _ = xyz.shape
    c_out = params["mlp"][-1][0].shape[1]

    density = compute_density(xyz, bandwidth)                   # [B, N]  (Pallas)
    inv_density = 1.0 / density

    if group_all:
        S, K = 1, N
        new_xyz = jnp.zeros((B, 1, 3), jnp.float32)
        # un-normalized grouped xyz (reference repo semantics for group_all)
        new_points = jnp.concatenate([xyz, points.astype(jnp.float32)],
                                     axis=-1)[:, None]                       # [B,1,N,3+D]
        grouped_inv_density = inv_density[:, None, :]                        # [B,1,N]
    else:
        S, K = npoint, nsample
        fps_idx = farthest_point_sample(xyz, npoint)            # [B, S]     (Pallas)
        new_xyz = index_points(xyz, fps_idx)                    # [B, S, 3]
        idx = knn_point(nsample, xyz, new_xyz)                  # [B, S, K]  (Pallas dist)
        grouped_xyz = index_points(xyz, idx)                    # [B, S, K, 3]
        grouped_xyz_norm = grouped_xyz - new_xyz[:, :, None, :]
        grouped_points = index_points(points, idx).astype(jnp.float32)       # [B, S, K, D]
        new_points = jnp.concatenate([grouped_xyz_norm, grouped_points], axis=-1)
        grouped_inv_density = index_points(inv_density[..., None], idx)[..., 0]

    # per-group max-normalisation of the inverse density (tiny [B,S,K] op)
    dmax = jnp.max(grouped_inv_density, axis=-1, keepdims=True)
    dens_norm = grouped_inv_density / jnp.maximum(dmax, 1e-12)

    G = B * S
    psum = sa_fused(new_points.reshape(G, K, -1),
                    dens_norm.reshape(G, K), params, c_out)     # [Gp, 16*c_out] (Pallas)
    out = fused_linear(psum, params["linear"], act=True)[:G]    # Linear + BN1d + ReLU
    return new_xyz, out.reshape(B, S, c_out)


def encoder_forward(params, xyz, feat):
    """PointConvEncoder.  xyz: [B,3,N], feat: [B,D,N] -> [B, 256]."""
    B = xyz.shape[0]
    xyz_t = jnp.transpose(xyz, (0, 2, 1)).astype(jnp.float32)
    feat_t = jnp.transpose(feat, (0, 2, 1)).astype(jnp.float32)
    l1_xyz, l1_points = sa_forward(params["sa1"], xyz_t, feat_t, **params["sa1_cfg"])
    l2_xyz, l2_points = sa_forward(params["sa2"], l1_xyz, l1_points, **params["sa2_cfg"])
    _, l3_points = sa_forward(params["sa3"], l2_xyz, l2_points, **params["sa3_cfg"])
    x = l3_points.reshape(B, 1024)
    # fc1+bn1+relu (+dropout=id) and fc2+bn2+relu fused into one resident-VMEM call
    return fused_mlp(x, params["fc"], acts=(True, True))


def fpm_forward(layers, x):
    # TODO(synk): FeaturePropogationModule definition unavailable; global-context
    #             MLP stand-in with out_features=256 (matches the fc heads).
    B, T, C = x.shape
    g = jnp.max(x, axis=1, keepdims=True)
    h = jnp.concatenate([x, jnp.broadcast_to(g, x.shape)], axis=-1).reshape(B * T, 2 * C)
    h = fused_mlp(h, layers, acts=(True, False))
    return h.reshape(B, T, C)


def model_forward(params, tooth_pcs, jaw_pc):
    """PointConvDensityClsSsg.forward (sep_enc=False path)."""
    B, T, C6, N = tooth_pcs.shape
    tooth_re = tooth_pcs.reshape(B * T, C6, N)
    tooth_fea = encoder_forward(params["tooth_encoder"],
                                tooth_re[:, :3, :], tooth_re[:, 3:, :])
    tooth_fea = tooth_fea.reshape(B, T, -1)
    jaw_fea = encoder_forward(params["jaw_encoder"], jaw_pc[:, :3, :], jaw_pc[:, 3:, :])
    tooth_fea = jnp.concatenate([tooth_fea, jaw_fea[:, None, :]], axis=1)    # [B, T+1, 256]
    tooth_fea = tooth_fea + fpm_forward(params["fpm"], tooth_fea)
    out = fused_heads(tooth_fea[:, :params["ntooth"], :],
                      params["head_w"], params["head_b"])                    # [B, T, V]
    return out


# ============================  demo  ============================

if __name__ == "__main__":
    key = jax.random.PRNGKey(0)
    kp, kt, kj = jax.random.split(key, 3)

    B, NTOOTH, N_TOOTH, N_JAW, NVALUES = 1, 4, 64, 128, 3
    params = make_model_params(kp, nvalues=NVALUES, ntooth=NTOOTH)

    tooth_pcs = jax.random.normal(kt, (B, NTOOTH, 6, N_TOOTH), jnp.float32)
    jaw_pc = jax.random.normal(kj, (B, 6, N_JAW), jnp.float32)

    out = model_forward(params, tooth_pcs, jaw_pc)
    out = jax.block_until_ready(out)
    assert out.shape == (B, NTOOTH, NVALUES), out.shape
    assert bool(jnp.all(jnp.isfinite(out)))
    print("KERNEL_OK")
</pallas_src>

<mosaic_0001>
module attributes {stable_mosaic.version = 11 : i64} {
  func.func @_density_kernel(%arg0: i32, %arg1: i32, %arg2: i32, %arg3: memref<1x64x3xf32, #tpu.memory_space<vmem>>, %arg4: memref<1x64x3xf32, #tpu.memory_space<vmem>>, %arg5: memref<1x1x64xf32, #tpu.memory_space<vmem>>, %arg6: memref<1x64xf32, #tpu.memory_space<vmem>>) attributes {dimension_semantics = [#tpu.dimension_semantics<parallel>, #tpu.dimension_semantics<parallel>, #tpu.dimension_semantics<arbitrary>], iteration_bounds = array<i64: 4, 1, 1>, scalar_prefetch = 0 : i64, scratch_operands = 1 : i64, tpu.core_type = #tpu.core_type<tc>, window_params = [{transform_indices = @transform_0, window_bounds = array<i64: 1, 64, 3>}, {transform_indices = @transform_1, window_bounds = array<i64: 1, 64, 3>}, {transform_indices = @transform_2, window_bounds = array<i64: 1, 1, 64>}]} {
    %c0_i32 = arith.constant 0 : i32
    %0 = arith.cmpi eq, %arg2, %c0_i32 : i32
    %1 = arith.extui %0 : i1 to i32
    %c0_i32_0 = arith.constant 0 : i32
    %2 = arith.cmpi ne, %1, %c0_i32_0 : i32
    scf.if %2 {
      %cst_21 = arith.constant 0.000000e+00 : f32
      %32 = vector.broadcast %cst_21 : f32 to vector<1x64xf32>
      %c0_22 = arith.constant 0 : index
      %c0_23 = arith.constant 0 : index
      %c0_24 = arith.constant 0 : index
      %33 = vector.load %arg5[%c0_22, %c0_23, %c0_24] : memref<1x1x64xf32, #tpu.memory_space<vmem>>, vector<1x1x64xf32>
      %34 = vector.shape_cast %33 : vector<1x1x64xf32> to vector<1x64xf32>
      %35 = vector.shape_cast %32 : vector<1x64xf32> to vector<1x1x64xf32>
      tpu.vector_store %arg5[%c0_22, %c0_23, %c0_24], %35 {strides = array<i32>} : memref<1x1x64xf32, #tpu.memory_space<vmem>>, vector<1x1x64xf32>,
      %c0_25 = arith.constant 0 : index
      %c0_26 = arith.constant 0 : index
      %c0_27 = arith.constant 0 : index
      %36 = vector.load %arg4[%c0_25, %c0_26, %c0_27] : memref<1x64x3xf32, #tpu.memory_space<vmem>>, vector<1x64x3xf32>
      %37 = vector.shape_cast %36 : vector<1x64x3xf32> to vector<64x3xf32>
      %cst_28 = arith.constant 1.000000e+00 : f32
      %38 = vector.broadcast %cst_28 : f32 to vector<1x3xf32>
      %39 = arith.mulf %37, %37 : vector<64x3xf32>
      %cst_29 = arith.constant dense<0.000000e+00> : vector<1x64xf32>
      %40 = tpu.matmul %38, %39, %cst_29 {dimension_numbers = #tpu.dot_dimension_numbers<[1], [1], [0], [0], [0, 0, 1, 0], [], []>} : vector<1x3xf32>, vector<64x3xf32>, vector<1x64xf32> -> vector<1x64xf32>
      %c0_30 = arith.constant 0 : index
      %c0_31 = arith.constant 0 : index
      %41 = vector.load %arg6[%c0_30, %c0_31] : memref<1x64xf32, #tpu.memory_space<vmem>>, vector<1x64xf32>
      tpu.vector_store %arg6[%c0_30, %c0_31], %40 {strides = array<i32>} : memref<1x64xf32, #tpu.memory_space<vmem>>, vector<1x64xf32>,
    } else {
    }
    %c0 = arith.constant 0 : index
    %c0_1 = arith.constant 0 : index
    %c0_2 = arith.constant 0 : index
    %3 = vector.load %arg3[%c0, %c0_1, %c0_2] : memref<1x64x3xf32, #tpu.memory_space<vmem>>, vector<1x64x3xf32>
    %4 = vector.shape_cast %3 : vector<1x64x3xf32> to vector<64x3xf32>
    %5 = arith.mulf %4, %4 : vector<64x3xf32>
    %cst = arith.constant dense<0.000000e+00> : vector<64xf32>
    %6 = vector.multi_reduction <add>, %5, %cst [1] : vector<64x3xf32> to vector<64xf32>
    %7 = vector.shape_cast %6 : vector<64xf32> to vector<64x1xf32>
    %c0_3 = arith.constant 0 : index
    %c0_4 = arith.constant 0 : index
    %c0_5 = arith.constant 0 : index
    %8 = vector.load %arg4[%c0_3, %c0_4, %c0_5] : memref<1x64x3xf32, #tpu.memory_space<vmem>>, vector<1x64x3xf32>
    %9 = vector.shape_cast %8 : vector<1x64x3xf32> to vector<64x3xf32>
    %cst_6 = arith.constant dense<0.000000e+00> : vector<64x64xf32>
    %10 = tpu.matmul %4, %9, %cst_6 {dimension_numbers = #tpu.dot_dimension_numbers<[1], [1], [0], [0], [0, 0, 1, 0], [], []>} : vector<64x3xf32>, vector<64x3xf32>, vector<64x64xf32> -> vector<64x64xf32>
    %c0_7 = arith.constant 0 : index
    %c0_8 = arith.constant 0 : index
    %11 = vector.load %arg6[%c0_7, %c0_8] : memref<1x64xf32, #tpu.memory_space<vmem>>, vector<1x64xf32>
    %12 = vector.broadcast %7 : vector<64x1xf32> to vector<64x64xf32>
    %13 = vector.broadcast %11 : vector<1x64xf32> to vector<64x64xf32>
    %14 = arith.addf %12, %13 : vector<64x64xf32>
    %cst_9 = arith.constant 2.000000e+00 : f32
    %15 = vector.broadcast %cst_9 : f32 to vector<64x64xf32>
    %16 = arith.mulf %15, %10 : vector<64x64xf32>
    %17 = arith.subf %14, %16 : vector<64x64xf32>
    %cst_10 = arith.constant -5.000000e+01 : f32
    %18 = vector.broadcast %cst_10 : f32 to vector<64x64xf32>
    %19 = arith.mulf %17, %18 : vector<64x64xf32>
    %20 = math.exp %19 : vector<64x64xf32>
    %cst_11 = arith.constant 1.000000e+00 : f32
    %21 = vector.broadcast %cst_11 : f32 to vector<1x64xf32>
    %cst_12 = arith.constant dense<0.000000e+00> : vector<1x64xf32>
    %22 = tpu.matmul %21, %20, %cst_12 {dimension_numbers = #tpu.dot_dimension_numbers<[1], [0], [0], [1], [0, 0, 1, 1], [], []>} : vector<1x64xf32>, vector<64x64xf32>, vector<1x64xf32> -> vector<1x64xf32>
    %c0_13 = arith.constant 0 : index
    %c0_14 = arith.constant 0 : index
    %c0_15 = arith.constant 0 : index
    %23 = vector.load %arg5[%c0_13, %c0_14, %c0_15] : memref<1x1x64xf32, #tpu.memory_space<vmem>>, vector<1x1x64xf32>
    %24 = vector.shape_cast %23 : vector<1x1x64xf32> to vector<1x64xf32>
    %25 = arith.addf %24, %22 : vector<1x64xf32>
    %c0_16 = arith.constant 0 : index
    %c0_17 = arith.constant 0 : index
    %c0_18 = arith.constant 0 : index
    %26 = vector.load %arg5[%c0_16, %c0_17, %c0_18] : memref<1x1x64xf32, #tpu.memory_space<vmem>>, vector<1x1x64xf32>
    %27 = vector.shape_cast %26 : vector<1x1x64xf32> to vector<1x64xf32>
    %28 = vector.shape_cast %25 : vector<1x64xf32> to vector<1x1x64xf32>
    tpu.vector_store %arg5[%c0_16, %c0_17, %c0_18], %28 {strides = array<i32>} : memref<1x1x64xf32, #tpu.memory_space<vmem>>, vector<1x1x64xf32>,
    %c0_i32_19 = arith.constant 0 : i32
    %29 = arith.cmpi eq, %arg2, %c0_i32_19 : i32
    %30 = arith.extui %29 : i1 to i32
    %c0_i32_20 = arith.constant 0 : i32
    %31 = arith.cmpi ne, %30, %c0_i32_20 : i32
    scf.if %31 {
      %c0_21 = arith.constant 0 : index
      %c0_22 = arith.constant 0 : index
      %c0_23 = arith.constant 0 : index
      %32 = vector.load %arg5[%c0_21, %c0_22, %c0_23] : memref<1x1x64xf32, #tpu.memory_space<vmem>>, vector<1x1x64xf32>
      %33 = vector.shape_cast %32 : vector<1x1x64xf32> to vector<1x64xf32>
      %cst_24 = arith.constant 6.250000e-02 : f32
      %34 = vector.broadcast %cst_24 : f32 to vector<1x64xf32>
      %35 = arith.mulf %33, %34 : vector<1x64xf32>
      %c0_25 = arith.constant 0 : index
      %c0_26 = arith.constant 0 : index
      %c0_27 = arith.constant 0 : index
      %36 = vector.load %arg5[%c0_25, %c0_26, %c0_27] : memref<1x1x64xf32, #tpu.memory_space<vmem>>, vector<1x1x64xf32>
      %37 = vector.shape_cast %36 : vector<1x1x64xf32> to vector<1x64xf32>
      %38 = vector.shape_cast %35 : vector<1x64xf32> to vector<1x1x64xf32>
      tpu.vector_store %arg5[%c0_25, %c0_26, %c0_27], %38 {strides = array<i32>} : memref<1x1x64xf32, #tpu.memory_space<vmem>>, vector<1x1x64xf32>,
    } else {
    }
    return
  }
  func.func @transform_0(%arg0: i32, %arg1: i32, %arg2: i32) -> (i32, i32, i32) {
    %c0_i32 = arith.constant 0 : i32
    %c0_i32_0 = arith.constant 0 : i32
    return %arg0, %arg2, %c0_i32 : i32, i32, i32
  }
  func.func @transform_1(%arg0: i32, %arg1: i32, %arg2: i32) -> (i32, i32, i32) {
    %c0_i32 = arith.constant 0 : i32
    %c0_i32_0 = arith.constant 0 : i32
    return %arg0, %arg1, %c0_i32 : i32, i32, i32
  }
  func.func @transform_2(%arg0: i32, %arg1: i32, %arg2: i32) -> (i32, i32, i32) {
    %c0_i32 = arith.constant 0 : i32
    %c0_i32_0 = arith.constant 0 : i32
    return %arg0, %c0_i32, %arg1 : i32, i32, i32
  }
}

</mosaic_0001>

<bundles_post_ra>
// kernel: compute_density.1
= control target key start
LH: loop header
LB: loop body
LE: loop exit
PB: predicated region body
PF: predicated region fallthrough
CT: control target
= control target key end

     0   :  { %7 = vsyncpa [#allocation4], 0  ;;  %s1315_s0 = inlined_call_operand.vmem [shape: f32[4,64,3], index: 0, kind: input, shape index: {}, may-alias: {0,1}]   ;;  %s1316_s1 = inlined_call_operand.vmem [shape: f32[4,64,3], index: 1, kind: input, shape index: {}, may-alias: {0,1}]   ;;  %s1317_s2 = inlined_call_operand.hbm [shape: f32[4,1,64], index: 2, kind: output, shape index: {}]  }
   0x1   :  { %9 = vsyncpa [#allocation4 + $0x1], 0  ;;  %s1093_s9 = smov 0   ;;  %s1095_s10 = smov 0  }
   0x2   :  { %s1097_s11 = smov 0   ;;  %s1099_s12 = smov 0  }
   0x3   :  { %s1101_s13 = smov 0   ;;  %s1103_s14 = smov 0  }
   0x4 LB: > { %s781_s15 = sadd.s32 4294967295, %s1072_s14   ;;  %s782_s16 = sadd.s32 4294967294, %s1072_s14   ;;  %s1072_s14 = sphi %s1103_s14, %s15_s14   ;;  %s1068_s13 = sphi %s1101_s13, %s1324_s13   ;;  %s1064_s12 = sphi %s1099_s12, %s1323_s12   ;;  %s1060_s11 = sphi %s1097_s11, %s1322_s11   ;;  %s1056_s10 = sphi %s1095_s10, %s1321_s10   ;;  %s1052_s9 = sphi %s1093_s9, %s1320_s9  }
   0x5   : > { %s34_s17 = sadd.s32 1, %s1068_s13  ;;  %s99_s18 = sadd.s32 1, %s1060_s11 }
   0x6   : > { %p36_p0 = scmp.ge.s32.totalorder %s34_s17, 4  ;;  %p109_p1 = scmp.ne.s32.totalorder %s1060_s11, %s1056_s10 }
   0x7   : > { %p110_p2 = scmp.eq.s32.totalorder %s781_s15, 3  ;;  %p115_p3 = scmp.ne.s32.totalorder %s1056_s10, %s1052_s9 }
   0x8   : > { %s1326_s17 = smov (%p36_p0, %s34_s17), 0  ;;  %p116_p5 = scmp.eq.s32.totalorder %s782_s16, 3 }
   0x9   : > { %p1133_p4 = por %p110_p2, %p109_p1  ;;  %s94_s20 = ssub.s32 %s1068_s13, %s1326_s17 }
   0xa   : > { %p785_p6 = scmp.ge.s32.totalorder %s1072_s14, 1  ;;  %p97_p7 = scmp.eq.s32.totalorder %s94_s20, 0 }
   0xb   : > { %p1140_p8 = por %p116_p5, %p115_p3  ;;  %p160_p9 = scmp.lt.s32.totalorder %s1072_s14, 5 }
   0xc   : > { %s1146_s22 = scalar_select %p97_p7, %s1060_s11, %s99_s18  }
   0xd   : > { %p161_p10 = pnand %p785_p6, %p160_p9 }
   0xe   : > { %p195_p11 = scmp.lt.s32.totalorder (!%p161_p10), %s1064_s12, 3  ;;  %s192_s3 = sand.u32 (!%p161_p10), 1, %s1056_s10  }
   0xf   : > { %164 = sbr.rel (%p161_p10) target bundleno = 517 (0x205), region = 28  ;;  %s1254_s4 = scalar_lea.vmem (!%p161_p10), [#allocation3], %s192_s3 }
  0x10   : > { %s817_s5 = sshll.u32 (!%p161_p10), %s1064_s12, 4  ;;  %s690_s6 = sshll.u32 (!%p161_p10), %s1254_s4, 4  ;;  %s691_s6 = int_to_ptr.vmem [resolvable:$true] %s690_s6 }
  0x11   : > { %s688_s15 = scalar_lea.hbm (!%p161_p10), %s1317_s2, %s817_s5  ;;  %s677_s16 = scalar_lea.sflag (!%p161_p10), [#allocation4], %s192_s3 }
  0x12   : > { %s996_s18 = scalar_lea.vmem (!%p161_p10), %s691_s6, 16  ;;  %s1077_s20 = smov (!%p161_p10), [#allocation3]  }
  0x13   : > { %p997_p12 = scmp.ne.s32.totalorder (!%p161_p10), %s691_s6, %s996_s18 }
  0x14   : > { %v1074_v0 = vmov 0.0   ;;  %vm1075_vm0 = vmmov 0   ;;  %s196_s23 = scalar_select %p195_p11, %s1064_s12, 3  ;;  %vm236_vm1 = vcmask 23552   ;;  %v1076_v41 = vmov 1.0  }
  0x15   : > { %856 = vmatprep.subr.mxu0 %v1074_v0  ;;  %872 = vmatprep.mubr.msk.f32.mxu0 %vm1075_vm0, %v1074_v0  ;;  %vm218_vm2 = vcmask 516096   ;;  %vm592_vm3 = vcmask 523264   ;;  %p998_p13 = pnand %p997_p12, %p1133_p4 }
  0x16   : > { %s820_s24 = sshll.u32 %s196_s23, 6  ;;  %219 = vst.msk [vmem:[%s1254_s4] sm:$0x1] %vm218_vm2, %v1074_v0  ;;  %s1000_s23 = sshll.u32 %s1077_s20, 4  ;;  %s1001_s23 = int_to_ptr.vmem [resolvable:$false] %s1000_s23 }
  0x17   : > { %s1156_s27 = scalar_lea.vmem %s1316_s1, %s820_s24  ;;  %s1161_s30 = scalar_lea.vmem %s1315_s0, %s820_s24 }
  0x18   : > { %v383_v1 = vld [vmem:[%s1156_s27 + $0x38] sm:$0xff]  ;;  %v382_v2 = vld [vmem:[%s1156_s27 + $0x30] sm:$0xff]  ;;  %v335_v4 = vld [vmem:[%s1161_s30] sm:$0xff]  ;;  %p999_p0 = pneg %p998_p13  ;;  %s1002_s12 = scalar_lea.vmem %s1001_s23, 32 }
  0x19   : > { %875 = vmatprep.subr.msk.mxu1 %vm236_vm1, %v383_v1  ;;  %v235_v3 = vmul.f32 %v383_v1, %v383_v1  ;;  %v234_v5 = vmul.f32 %v382_v2, %v382_v2  ;;  %v381_v6 = vld [vmem:[%s1156_s27 + $0x28] sm:$0xff]  ;;  %891 = vmatprep.mubr.msk.f32.mxu1 %vm236_vm1, %v335_v4  ;;  %v1174_v7 = vld [vmem:[%s1161_s30 + $0x20] sm:$0xff]  ;;  %v1180_v9 = vld [vmem:[%s1161_s30 + $0x30] sm:$0xff]  ;;  %v343_v27 = vmul.f32 %v335_v4, %v335_v4  ;;  %p1003_p1 = scmp.lt.s32.totalorder %s691_s6, %s1001_s23  ;;  %p1004_p2 = scmp.lt.s32.totalorder %s1002_s12, %s996_s18 }
  0x1a   : > { %876 = vmatpush3.xpose.msk.msra.mxu1 %vm236_vm1, %v383_v1  ;;  %v1177_v8 = vld [vmem:[%s1161_s30 + $0x28] sm:$0xff]  ;;  %v1183_v10 = vld [vmem:[%s1161_s30 + $0x38] sm:$0xff]  ;;  %v347_v12 = vmul.f32 %v1174_v7, %v1174_v7  ;;  %v349_v14 = vmul.f32 %v1180_v9, %v1180_v9  ;;  %v233_v15 = vmul.f32 %v381_v6, %v381_v6  ;;  %v380_v17 = vld [vmem:[%s1156_s27 + $0x20] sm:$0xff] }
  0x1b   : > { %857 = vmatpush3.xpose.msk.msra.mxu0 %vm236_vm1, %v235_v3  ;;  %877 = vmatprep.subr.msk.mxu1 %vm236_vm1, %v382_v2  ;;  %v348_v11 = vmul.f32 %v1177_v8, %v1177_v8  ;;  %v350_v13 = vmul.f32 %v1183_v10, %v1183_v10  ;;  %v337_v18 = vld [vmem:[%s1161_s30 + $0x10] sm:$0xff]  ;;  %v338_v20 = vld [vmem:[%s1161_s30 + $0x18] sm:$0xff]  ;;  %v232_v25 = vmul.f32 %v380_v17, %v380_v17  ;;  %v336_v28 = vld [vmem:[%s1161_s30 + $0x8] sm:$0xff]  ;;  %v352_v34 = vsel %vm236_vm1, %v343_v27, 0.0  ;;  %p1005_p3 = por %p1004_p2, %p1003_p1 }
  0x1c   : > { %858 = vmatprep.subr.mxu0 %v1074_v0  ;;  %v364_v21 = vsel %vm236_vm1, %v347_v12, 0.0  ;;  %v345_v22 = vmul.f32 %v337_v18, %v337_v18  ;;  %v370_v23 = vsel %vm236_vm1, %v349_v14, 0.0  ;;  %v346_v24 = vmul.f32 %v338_v20, %v338_v20  ;;  %v379_v26 = vld [vmem:[%s1156_s27 + $0x18] sm:$0xff]  ;;  %v378_v33 = vld [vmem:[%s1156_s27 + $0x10] sm:$0xff]  ;;  %v377_v37 = vld [vmem:[%s1156_s27 + $0x8] sm:$0xff] }
  0x1d   : > { %v367_v16 = vsel %vm236_vm1, %v348_v11, 0.0  ;;  %v373_v19 = vsel %vm236_vm1, %v350_v13, 0.0  ;;  %v344_v31 = vmul.f32 %v336_v28, %v336_v28  ;;  %v231_v32 = vmul.f32 %v379_v26, %v379_v26  ;;  %v376_v39 = vld [vmem:[%s1156_s27] sm:$0xff]  ;;  %p1006_p5 = pnand %p1005_p3, %p999_p0 }
  0x1e   : > { %878 = vmatpush3.xpose.msk.msra.mxu1 %vm236_vm1, %v382_v2  ;;  %368 = vadd.xlane.f32.xlu1 %v367_v16  ;;  %v358_v29 = vsel %vm236_vm1, %v345_v22, 0.0  ;;  %v361_v30 = vsel %vm236_vm1, %v346_v24, 0.0  ;;  %v230_v36 = vmul.f32 %v378_v33, %v378_v33  ;;  %v229_v38 = vmul.f32 %v377_v37, %v377_v37 }
  0x1f   : > { %859 = vmatpush3.xpose.msk.msra.mxu0 %vm236_vm1, %v234_v5  ;;  %879 = vmatprep.subr.msk.mxu1 %vm236_vm1, %v381_v6  ;;  %v355_v35 = vsel %vm236_vm1, %v344_v31, 0.0  ;;  %v228_v40 = vmul.f32 %v376_v39, %v376_v39 }
  0x20   : > { %860 = vmatprep.subr.mxu0 %v1074_v0  ;;  %374 = vadd.xlane.f32.xlu0 %v373_v19 }
  0x22   : > { %880 = vmatpush3.xpose.msk.msra.mxu1 %vm236_vm1, %v381_v6  ;;  %365 = vadd.xlane.f32.xlu1 %v364_v21 }
  0x23   : > { %861 = vmatpush3.xpose.msk.msra.mxu0 %vm236_vm1, %v233_v15  ;;  %881 = vmatprep.subr.msk.mxu1 %vm236_vm1, %v380_v17 }
  0x24   : > { %862 = vmatprep.subr.mxu0 %v1074_v0  ;;  %371 = vadd.xlane.f32.xlu0 %v370_v23 }
  0x26   : > { %882 = vmatpush3.xpose.msk.msra.mxu1 %vm236_vm1, %v380_v17  ;;  %359 = vadd.xlane.f32.xlu1 %v358_v29 }
  0x27   : > { %863 = vmatpush3.xpose.msk.msra.mxu0 %vm236_vm1, %v232_v25  ;;  %883 = vmatprep.subr.msk.mxu1 %vm236_vm1, %v379_v26 }
  0x28   : > { %864 = vmatprep.subr.mxu0 %v1074_v0  ;;  %362 = vadd.xlane.f32.xlu0 %v361_v30 }
  0x2a   : > { %884 = vmatpush3.xpose.msk.msra.mxu1 %vm236_vm1, %v379_v26  ;;  %353 = vadd.xlane.f32.xlu1 %v352_v34 }
  0x2b   : > { %865 = vmatpush3.xpose.msk.msra.mxu0 %vm236_vm1, %v231_v32  ;;  %885 = vmatprep.subr.msk.mxu1 %vm236_vm1, %v378_v33 }
  0x2c   : > { %866 = vmatprep.subr.mxu0 %v1074_v0  ;;  %356 = vadd.xlane.f32.xlu0 %v355_v35 }
  0x2e   : > { %886 = vmatpush3.xpose.msk.msra.mxu1 %vm236_vm1, %v378_v33 }
  0x2f   : > { %867 = vmatpush3.xpose.msk.msra.mxu0 %vm236_vm1, %v230_v36  ;;  %887 = vmatprep.subr.msk.mxu1 %vm236_vm1, %v377_v37 }
  0x30   : > { %868 = vmatprep.subr.mxu0 %v1074_v0 }
  0x32   : > { %888 = vmatpush3.xpose.msk.msra.mxu1 %vm236_vm1, %v377_v37 }
  0x33   : > { %869 = vmatpush3.xpose.msk.msra.mxu0 %vm236_vm1, %v229_v38  ;;  %889 = vmatprep.subr.msk.mxu1 %vm236_vm1, %v376_v39 }
  0x34   : > { %870 = vmatprep.subr.mxu0 %v1074_v0 }
  0x36   : > { %890 = vmatpush3.xpose.msk.msra.mxu1 %vm236_vm1, %v376_v39 }
  0x37   : > { %871 = vmatpush3.xpose.msk.msra.mxu0 %vm236_vm1, %v228_v40 }
  0x38   : > { %903 = vmatprep.subr.mxu0 %v1074_v0 }
  0x39   : > { %892 = vmatmul.mubr.msk.f32.vlgmr.msra.gmra.mxu1 %vm236_vm1, %v336_v28 }
  0x3a   : > { %873 = vmatmul.mubr.msk.f32.vlgmr.msra.gmra.mxu0 %vm236_vm1, %v1076_v41  ;;  %894 = vmatprep.mubr.msk.f32.mxu1 %vm236_vm1, %v337_v18 }
  0x3b   : > { %919 = vmatprep.mubr.msk.f32.mxu0 %vm1075_vm0, %v1074_v0 }
  0x3d   : > { %895 = vmatmul.mubr.msk.f32.gmra.mxu1 %vm236_vm1, %v338_v20 }
  0x3e   : > { %897 = vmatprep.mubr.msk.f32.mxu1 %vm236_vm1, %v1174_v7 }
  0x41   : > { %898 = vmatmul.mubr.msk.f32.gmra.mxu1 %vm236_vm1, %v1177_v8 }
  0x42   : > { %900 = vmatprep.mubr.msk.f32.mxu1 %vm236_vm1, %v1180_v9 }
  0x45   : > { %901 = vmatmul.mubr.msk.f32.gmra.mxu1 %vm236_vm1, %v1183_v10 }
  0xa7   : > { %v369_v44 = vpop.xlane.xlu1 %368 }
  0xa9   : > { %v375_v42 = vpop.xlane.xlu0 %374 }
  0xab   : > { %v366_v51 = vpop.xlane.xlu1 %365 }
  0xad   : > { %v372_v48 = vpop.xlane.xlu0 %371 }
  0xaf   : > { %v360_v59 = vpop.xlane.xlu1 %359 }
  0xb1   : > { %v363_v54 = vpop.xlane.xlu0 %362 }
  0xb3   : > { %v354_v15 = vpop.xlane.xlu1 %353 }
  0xb5   : > { %v357_v5 = vpop.xlane.xlu0 %356 }
  0xf9   : > { %v893_v43 = vpop.f32.mrf.mxu1 }
  0xfa   : > { %v330_v45 = vpop.f32.mrf.mxu0  ;;  %v553_v20 = vmul.f32 2.0, %v893_v43 }
  0xfb   : > { %334 = vst.msk [vmem:[#allocation2] sm:$0x1] %vm218_vm2, %v330_v45  ;;  %v498_v46 = vpop.f32.mrf.mxu1 }
  0xfc   : > { %v874_v47 = vpop.f32.mrf.mxu0  ;;  %v552_v25 = vmul.f32 2.0, %v498_v46 }
  0xfd   : > { %v896_v49 = vpop.f32.mrf.mxu1  ;;  %v666_v47 = vld [vmem:[%s1254_s4] sm:$0x1] }
  0xfe   : > { %v555_v8 = vmul.f32 2.0, %v896_v49 }
  0xff   : > { %v508_v50 = vpop.f32.mrf.mxu1 }
 0x100   : > { %v554_v13 = vmul.f32 2.0, %v508_v50 }
 0x101   : > { %v899_v52 = vpop.f32.mrf.mxu1 }
 0x102   : > { %v815_v53 = vld [vmem:[#allocation2] ss:$0 sm:$0xff]  ;;  %v557_v57 = vmul.f32 2.0, %v899_v52 }
 0x103   : > { %v518_v55 = vpop.f32.mrf.mxu1  ;;  %v549_v56 = vadd.f32 %v815_v53, %v369_v44  ;;  %v548_v60 = vadd.f32 %v815_v53, %v366_v51  ;;  %v551_v62 = vadd.f32 %v815_v53, %v375_v42  ;;  %v550_v2 = vadd.f32 %v815_v53, %v372_v48 }
 0x104   : > { %v556_v61 = vmul.f32 2.0, %v518_v55  ;;  %v547_v3 = vadd.f32 %v815_v53, %v363_v54  ;;  %v546_v9 = vadd.f32 %v815_v53, %v360_v59  ;;  %v545_v14 = vadd.f32 %v815_v53, %v357_v5 }
 0x105   : > { %v902_v58 = vpop.f32.mrf.mxu1  ;;  %v565_v4 = vsub.f32 %v549_v56, %v557_v57  ;;  %v544_v22 = vadd.f32 %v815_v53, %v354_v15 }
 0x106   : > { %v559_v63 = vmul.f32 2.0, %v902_v58  ;;  %v564_v10 = vsub.f32 %v548_v60, %v556_v61  ;;  %v563_v16 = vsub.f32 %v547_v3, %v555_v8  ;;  %v562_v21 = vsub.f32 %v546_v9, %v554_v13 }
 0x107   : > { %v528_v1 = vpop.f32.mrf.mxu1  ;;  %v573_v17 = vmul.f32 -50.0, %v565_v4  ;;  %v561_v28 = vsub.f32 %v545_v14, %v553_v20  ;;  %v560_v30 = vsub.f32 %v544_v22, %v552_v25 }
 0x108   : > { %v567_v6 = vsub.f32 %v551_v62, %v559_v63  ;;  %v558_v7 = vmul.f32 2.0, %v528_v1  ;;  %v572_v23 = vmul.f32 -50.0, %v564_v10  ;;  %v571_v26 = vmul.f32 -50.0, %v563_v16 }
 0x109   : > { %v586_v27 = vmul.f32 1.442695, %v573_v17  ;;  %v570_v29 = vmul.f32 -50.0, %v562_v21  ;;  %v569_v33 = vmul.f32 -50.0, %v561_v28  ;;  %v568_v35 = vmul.f32 -50.0, %v560_v30 }
 0x10a   : > { %v575_v11 = vmul.f32 -50.0, %v567_v6  ;;  %v566_v12 = vsub.f32 %v550_v2, %v558_v7  ;;  %v584_v31 = vmul.f32 1.442695, %v572_v23  ;;  %v582_v32 = vmul.f32 1.442695, %v571_v26 }
 0x10b   : > { %v580_v34 = vmul.f32 1.442695, %v570_v29  ;;  %v578_v36 = vmul.f32 1.442695, %v569_v33  ;;  %v576_v37 = vmul.f32 1.442695, %v568_v35 }
 0x10c   : > { %v590_v18 = vmul.f32 1.442695, %v575_v11  ;;  %v574_v19 = vmul.f32 -50.0, %v566_v12 }
 0x10e   : > { %v588_v24 = vmul.f32 1.442695, %v574_v19  ;;  %980 = vpow2.f32 %v590_v18 }
 0x110   : > { %982 = vpow2.f32 %v588_v24 }
 0x111   : > { %984 = vpow2.f32 %v586_v27 }
 0x112   : > { %986 = vpow2.f32 %v584_v31 }
 0x113   : > { %988 = vpow2.f32 %v582_v32 }
 0x114   : > { %990 = vpow2.f32 %v580_v34 }
 0x115   : > { %992 = vpow2.f32 %v578_v36 }
 0x116   : > { %994 = vpow2.f32 %v576_v37 }
 0x11b   : > { %v981_v38 = vpop.eup %980 }
 0x11c   : > { %904 = vmatpush3.msra.mxu0 %v981_v38 }
 0x11d   : > { %v983_v39 = vpop.eup %982  ;;  %905 = vmatprep.subr.mxu0 %v1074_v0 }
 0x11e   : > { %906 = vmatpush3.msra.mxu0 %v983_v39  ;;  %v985_v40 = vpop.eup %984 }
 0x11f   : > { %907 = vmatprep.subr.mxu0 %v1074_v0  ;;  %v987_v42 = vpop.eup %986 }
 0x120   : > { %908 = vmatpush3.msra.mxu0 %v985_v40  ;;  %v989_v43 = vpop.eup %988 }
 0x121   : > { %909 = vmatprep.subr.mxu0 %v1074_v0  ;;  %v991_v44 = vpop.eup %990 }
 0x122   : > { %910 = vmatpush3.msra.mxu0 %v987_v42  ;;  %v993_v45 = vpop.eup %992 }
 0x123   : > { %911 = vmatprep.subr.mxu0 %v1074_v0  ;;  %v995_v46 = vpop.eup %994 }
 0x124   : > { %912 = vmatpush3.msra.mxu0 %v989_v43 }
 0x125   : > { %913 = vmatprep.subr.mxu0 %v1074_v0 }
 0x126   : > { %914 = vmatpush3.msra.mxu0 %v991_v44 }
 0x127   : > { %915 = vmatprep.subr.mxu0 %v1074_v0 }
 0x128   : > { %916 = vmatpush3.msra.mxu0 %v993_v45 }
 0x129   : > { %917 = vmatprep.subr.mxu0 %v1074_v0 }
 0x12a   : > { %918 = vmatpush3.msra.mxu0 %v995_v46 }
 0x12b   : > { %920 = vmatmul.mubr.msk.f32.vlgmr.msra.gmra.mxu0 %vm592_vm3, %v1076_v41 }
 0x1eb   : > { %v662_v48 = vpop.f32.mrf.mxu0 }
 0x1ec   : > { %v667_v49 = vadd.f32 %v666_v47, %v662_v48 }
 0x1ed   : > { %v921_v50 = vpop.f32.mrf.mxu0 }
 0x1ee   : > { %669 = vst.msk [vmem:[%s1254_s4] sm:$0x1] %vm218_vm2, %v667_v49 }
 0x1f5   : > { %v673_v51 = vld [vmem:[%s1254_s4] sm:$0x1] }
 0x1f6   : > { %v674_v52 = vmul.f32 0.0625, %v673_v51 }
 0x1f8   : > { %675 = vst.msk [vmem:[%s1254_s4] sm:$0x1] %vm218_vm2, %v674_v52 }
 0x1f9   : > { %1009 = shalt.err (!%p1006_p5)
}
 0x1fa   : > { %s1010_s24 = scalar_lea.hbm %s688_s15, 16  ;;  %s1014_s27 = scalar_lea.hbm %s1317_s2, 64 }
 0x1fb   : > { %p1011_p6 = scmp.ne.s32.totalorder %s688_s15, %s1010_s24  ;;  %p1015_p10 = scmp.lt.s32.totalorder %s688_s15, %s1317_s2 }
 0x1fc   : > { %p1016_p11 = scmp.lt.s32.totalorder %s1014_s27, %s1010_s24 }
 0x1fd   : > { %p1012_p7 = pnand %p1011_p6, %p1133_p4 }
 0x1fe   : > { %p1017_p12 = por %p1016_p11, %p1015_p10 }
 0x1ff   : > { %p1013_p9 = pneg %p1012_p7 }
 0x201   : > { %p1018_p13 = pnand %p1017_p12, %p1013_p9 }
 0x203   : > { %1021 = shalt.err (!%p1018_p13)
}
 0x204   : > { %922 = dma.vmem_to_hbm [thread:$0]  (%p1133_p4), %s691_s6, 16, %s688_s15, %s677_s16  }
 0x205 PF: > { %p928_p0 = scmp.ge.s32.totalorder %s1072_s14, 2  ;;  %s702_s30 = sand.u32 1, %s1052_s9  }
 0x206   : > { %s703_s3 = scalar_lea.sflag [#allocation4], %s702_s30 }
 0x207   : > { %p925_p1 = pnand %p928_p0, %p1140_p8 }
 0x209   : > { %p926_p2 = pneg %p925_p1 }
 0x20b   : > { %1047 = dma.done.wait (%p926_p2), %s703_s3, 16  }
 0x20c   : > { %1049 = vsyncadd (%p926_p2), %s703_s3, 4294967280  ;;  %s15_s14 = sadd.s32 1, %s1072_s14   ;;  %s1320_s9 = smov %s1056_s10 }
 0x20d   : > { %p12_p3 = scmp.ge.s32.totalorder %s15_s14, 6   ;;  %s1321_s10 = smov %s1060_s11 }
 0x20e   : > { %s1322_s11 = smov %s1146_s22  ;;  %s1323_s12 = smov %s1068_s13 }
 0x20f   : > { %s1324_s13 = smov %s1326_s17  ;;  %14 = sbr.rel (!%p12_p3) target bundleno = 4 (0x4), region = 74 }
 0x214   :  { %707 = vsyncpa [#allocation4], 1 }
 0x215   :  { %709 = vsyncpa [#allocation4 + $0x1], 1 }

</bundles_post_ra>
